<compile_context>
chip_gen: v6e
topology: v6e:2x2x1
jax: 0.10.0
libtpu: 0.0.40
codegen_flags: <defaults>
</compile_context>

<pallas_src>
import jax
import jax.numpy as jnp
from jax.experimental import pallas as pl
from jax.experimental.pallas import tpu as pltpu


_TARGET_BLOCK_BYTES = 2 * 1024 * 1024  # ~2 MiB input blocks for this mem-bound op


def _split_strided_kernel(x_ref, even_ref, odd_ref):
    """Stride-2 lane de-interleave: even lanes -> even_ref, odd lanes -> odd_ref."""
    ne = even_ref.shape[-1]
    no = odd_ref.shape[-1]
    even_ref[...] = x_ref[:, pl.ds(0, ne, 2)]
    odd_ref[...] = x_ref[:, pl.ds(1, no, 2)]


def _split_matmul_kernel(x_ref, se_ref, so_ref, even_ref, odd_ref):
    """Fallback: de-interleave via 0/1 selection matrices (bit-exact for floats)."""
    x = x_ref[...]
    even_ref[...] = jnp.dot(
        x, se_ref[...], preferred_element_type=jnp.float32).astype(even_ref.dtype)
    odd_ref[...] = jnp.dot(
        x, so_ref[...], preferred_element_type=jnp.float32).astype(odd_ref.dtype)


def _row_tile(rows, row_bytes):
    """Row tile: multiple of 8 (or == rows), ~2 MiB blocks, >=2 grid steps if possible."""
    if rows <= 8:
        return rows
    t = min(rows, max(8, _TARGET_BLOCK_BYTES // max(row_bytes, 1)))
    t = min(t, -(-rows // 2))  # keep at least 2 grid steps (v7x has 2 TensorCores)
    return max(8, (t // 8) * 8)


def _pallas_split(x2, ne, no):
    """x2: (rows, lanes). Returns (rows, ne) even-lane and (rows, no) odd-lane parts."""
    rows, lanes = x2.shape
    tm = _row_tile(rows, lanes * x2.dtype.itemsize)
    grid = (pl.cdiv(rows, tm),)
    out_shape = (jax.ShapeDtypeStruct((rows, ne), x2.dtype),
                 jax.ShapeDtypeStruct((rows, no), x2.dtype))
    out_specs = (pl.BlockSpec((tm, ne), lambda i: (i, 0)),
                 pl.BlockSpec((tm, no), lambda i: (i, 0)))
    params = pltpu.CompilerParams(dimension_semantics=("parallel",))

    try:
        even, odd = pl.pallas_call(
            _split_strided_kernel,
            out_shape=out_shape,
            grid=grid,
            in_specs=[pl.BlockSpec((tm, lanes), lambda i: (i, 0))],
            out_specs=out_specs,
            compiler_params=params,
        )(x2)
        jax.block_until_ready((even, odd))
        return even, odd
    except Exception:
        # Strided lane loads unsupported on this toolchain -> exact 0/1
        # selection matmuls on the MXU (same lane-dense blocks, no upcast).
        se = jnp.zeros((lanes, ne), x2.dtype).at[
            jnp.arange(0, 2 * ne, 2), jnp.arange(ne)].set(1)
        so = jnp.zeros((lanes, no), x2.dtype).at[
            jnp.arange(1, 2 * no + 1, 2), jnp.arange(no)].set(1)
        even, odd = pl.pallas_call(
            _split_matmul_kernel,
            out_shape=out_shape,
            grid=grid,
            in_specs=[pl.BlockSpec((tm, lanes), lambda i: (i, 0)),
                      pl.BlockSpec((lanes, ne), lambda i: (0, 0)),
                      pl.BlockSpec((lanes, no), lambda i: (0, 0))],
            out_specs=out_specs,
            compiler_params=params,
        )(x2, se, so)
        return even, odd


def splitting_forward(x):
    """Returns (even, odd) = (x[..., ::2], x[..., 1::2]) for an NCHW tensor."""
    N, C, H, W = x.shape
    We, Wo = (W + 1) // 2, W // 2
    M = N * C * H
    total = M * W

    if M == 0 or W < 2:
        # Degenerate sizes: nothing worth running through a kernel.
        return x[..., ::2], x[..., 1::2]

    if W % 2 == 0 and total % 256 == 0:
        # Lane-dense fast path: fold rows of 256 elements.  With even W, the
        # global even/odd parity matches lane parity, so each output tile is a
        # full 128-lane slab and reshapes back with zero extra passes.
        x2 = x.reshape(total // 256, 256)
        even2, odd2 = _pallas_split(x2, 128, 128)
    else:
        # General path: one (N, C, H) row per sublane row, W on lanes.
        x2 = x.reshape(M, W)
        even2, odd2 = _pallas_split(x2, We, Wo)

    even = even2.reshape(N, C, H, We)
    odd = odd2.reshape(N, C, H, Wo)
    return even, odd


if __name__ == "__main__":
    key = jax.random.PRNGKey(0)
    # Small NCHW input consistent with the module's conv-style indexing.
    x = jax.random.normal(key, (2, 4, 16, 16), dtype=jnp.float32)

    even, odd = splitting_forward(x)
    jax.block_until_ready((even, odd))

    # Reference semantics (same as the PyTorch lambdas).
    ref_even = x[:, :, :, ::2]
    ref_odd = x[:, :, :, 1::2]

    assert even.shape == ref_even.shape, (even.shape, ref_even.shape)
    assert odd.shape == ref_odd.shape, (odd.shape, ref_odd.shape)
    assert jnp.array_equal(even, ref_even)
    assert jnp.array_equal(odd, ref_odd)

    print("KERNEL_OK")
</pallas_src>

<mosaic_0001>
module attributes {stable_mosaic.version = 11 : i64} {
  func.func @_split_strided_kernel(%arg0: i32, %arg1: memref<8x256xf32, #tpu.memory_space<vmem>>, %arg2: memref<8x128xf32, #tpu.memory_space<vmem>>, %arg3: memref<8x128xf32, #tpu.memory_space<vmem>>) attributes {dimension_semantics = [#tpu.dimension_semantics<parallel>], iteration_bounds = array<i64: 1>, scalar_prefetch = 0 : i64, scratch_operands = 0 : i64, tpu.core_type = #tpu.core_type<tc>, window_params = [{transform_indices = @transform_0, window_bounds = array<i64: 8, 256>}, {transform_indices = @transform_1, window_bounds = array<i64: 8, 128>}, {transform_indices = @transform_2, window_bounds = array<i64: 8, 128>}]} {
    %c0 = arith.constant 0 : index
    %c0_0 = arith.constant 0 : index
    %0 = tpu.strided_load %arg1[%c0, %c0_0] {strides = array<i32: 1, 2>} : memref<8x256xf32, #tpu.memory_space<vmem>>, vector<8x128xf32>
    %c0_1 = arith.constant 0 : index
    %c0_2 = arith.constant 0 : index
    %1 = vector.load %arg2[%c0_1, %c0_2] : memref<8x128xf32, #tpu.memory_space<vmem>>, vector<8x128xf32>
    tpu.vector_store %arg2[%c0_1, %c0_2], %0 {strides = array<i32>} : memref<8x128xf32, #tpu.memory_space<vmem>>, vector<8x128xf32>,
    %c0_3 = arith.constant 0 : index
    %c1 = arith.constant 1 : index
    %2 = tpu.strided_load %arg1[%c0_3, %c1] {strides = array<i32: 1, 2>} : memref<8x256xf32, #tpu.memory_space<vmem>>, vector<8x128xf32>
    %c0_4 = arith.constant 0 : index
    %c0_5 = arith.constant 0 : index
    %3 = vector.load %arg3[%c0_4, %c0_5] : memref<8x128xf32, #tpu.memory_space<vmem>>, vector<8x128xf32>
    tpu.vector_store %arg3[%c0_4, %c0_5], %2 {strides = array<i32>} : memref<8x128xf32, #tpu.memory_space<vmem>>, vector<8x128xf32>,
    return
  }
  func.func @transform_0(%arg0: i32) -> (i32, i32) {
    %c0_i32 = arith.constant 0 : i32
    %c0_i32_0 = arith.constant 0 : i32
    return %arg0, %c0_i32 : i32, i32
  }
  func.func @transform_1(%arg0: i32) -> (i32, i32) {
    %c0_i32 = arith.constant 0 : i32
    %c0_i32_0 = arith.constant 0 : i32
    return %arg0, %c0_i32 : i32, i32
  }
  func.func @transform_2(%arg0: i32) -> (i32, i32) {
    %c0_i32 = arith.constant 0 : i32
    %c0_i32_0 = arith.constant 0 : i32
    return %arg0, %c0_i32 : i32, i32
  }
}

module attributes {stable_mosaic.version = 11 : i64} {
  func.func @_split_matmul_kernel(%arg0: i32, %arg1: memref<8x256xf32, #tpu.memory_space<vmem>>, %arg2: memref<256x128xf32, #tpu.memory_space<vmem>>, %arg3: memref<256x128xf32, #tpu.memory_space<vmem>>, %arg4: memref<8x128xf32, #tpu.memory_space<vmem>>, %arg5: memref<8x128xf32, #tpu.memory_space<vmem>>) attributes {dimension_semantics = [#tpu.dimension_semantics<parallel>], iteration_bounds = array<i64: 1>, scalar_prefetch = 0 : i64, scratch_operands = 0 : i64, tpu.core_type = #tpu.core_type<tc>, window_params = [{transform_indices = @transform_0, window_bounds = array<i64: 8, 256>}, {pipeline_mode = #tpu.pipeline_mode<synchronous>, transform_indices = @transform_1, window_bounds = array<i64: 256, 128>}, {pipeline_mode = #tpu.pipeline_mode<synchronous>, transform_indices = @transform_2, window_bounds = array<i64: 256, 128>}, {transform_indices = @transform_3, window_bounds = array<i64: 8, 128>}, {transform_indices = @transform_4, window_bounds = array<i64: 8, 128>}]} {
    %c0 = arith.constant 0 : index
    %c0_0 = arith.constant 0 : index
    %0 = vector.load %arg1[%c0, %c0_0] : memref<8x256xf32, #tpu.memory_space<vmem>>, vector<8x256xf32>
    %c0_1 = arith.constant 0 : index
    %c0_2 = arith.constant 0 : index
    %1 = vector.load %arg2[%c0_1, %c0_2] : memref<256x128xf32, #tpu.memory_space<vmem>>, vector<256x128xf32>
    %cst = arith.constant dense<0.000000e+00> : vector<8x128xf32>
    %2 = tpu.matmul %0, %1, %cst {dimension_numbers = #tpu.dot_dimension_numbers<[1], [0], [0], [1], [0, 0, 1, 1], [], []>} : vector<8x256xf32>, vector<256x128xf32>, vector<8x128xf32> -> vector<8x128xf32>
    %c0_3 = arith.constant 0 : index
    %c0_4 = arith.constant 0 : index
    %3 = vector.load %arg4[%c0_3, %c0_4] : memref<8x128xf32, #tpu.memory_space<vmem>>, vector<8x128xf32>
    tpu.vector_store %arg4[%c0_3, %c0_4], %2 {strides = array<i32>} : memref<8x128xf32, #tpu.memory_space<vmem>>, vector<8x128xf32>,
    %c0_5 = arith.constant 0 : index
    %c0_6 = arith.constant 0 : index
    %4 = vector.load %arg3[%c0_5, %c0_6] : memref<256x128xf32, #tpu.memory_space<vmem>>, vector<256x128xf32>
    %cst_7 = arith.constant dense<0.000000e+00> : vector<8x128xf32>
    %5 = tpu.matmul %0, %4, %cst_7 {dimension_numbers = #tpu.dot_dimension_numbers<[1], [0], [0], [1], [0, 0, 1, 1], [], []>} : vector<8x256xf32>, vector<256x128xf32>, vector<8x128xf32> -> vector<8x128xf32>
    %c0_8 = arith.constant 0 : index
    %c0_9 = arith.constant 0 : index
    %6 = vector.load %arg5[%c0_8, %c0_9] : memref<8x128xf32, #tpu.memory_space<vmem>>, vector<8x128xf32>
    tpu.vector_store %arg5[%c0_8, %c0_9], %5 {strides = array<i32>} : memref<8x128xf32, #tpu.memory_space<vmem>>, vector<8x128xf32>,
    return
  }
  func.func @transform_0(%arg0: i32) -> (i32, i32) {
    %c0_i32 = arith.constant 0 : i32
    %c0_i32_0 = arith.constant 0 : i32
    return %arg0, %c0_i32 : i32, i32
  }
  func.func @transform_1(%arg0: i32) -> (i32, i32) {
    %c0_i32 = arith.constant 0 : i32
    %c0_i32_0 = arith.constant 0 : i32
    %c0_i32_1 = arith.constant 0 : i32
    return %c0_i32, %c0_i32_0 : i32, i32
  }
  func.func @transform_2(%arg0: i32) -> (i32, i32) {
    %c0_i32 = arith.constant 0 : i32
    %c0_i32_0 = arith.constant 0 : i32
    %c0_i32_1 = arith.constant 0 : i32
    return %c0_i32, %c0_i32_0 : i32, i32
  }
  func.func @transform_3(%arg0: i32) -> (i32, i32) {
    %c0_i32 = arith.constant 0 : i32
    %c0_i32_0 = arith.constant 0 : i32
    return %arg0, %c0_i32 : i32, i32
  }
  func.func @transform_4(%arg0: i32) -> (i32, i32) {
    %c0_i32 = arith.constant 0 : i32
    %c0_i32_0 = arith.constant 0 : i32
    return %arg0, %c0_i32 : i32, i32
  }
}

</mosaic_0001>

<bundles_post_ra>
// kernel: tpu_custom_call.1
= control target key start
LH: loop header
LB: loop body
LE: loop exit
PB: predicated region body
PF: predicated region fallthrough
CT: control target
= control target key end

     0   :  { %10 = vsyncpa [#allocation3], 0  ;;  %s527_s0 = inlined_call_operand.hbm [shape: f32[8,256], index: 0, kind: input, shape index: {}]   ;;  %s528_s1 = inlined_call_operand.hbm [shape: f32[256,128], index: 1, kind: input, shape index: {}]   ;;  %s529_s2 = inlined_call_operand.hbm [shape: f32[256,128], index: 2, kind: input, shape index: {}]   ;;  %s530_s3 = inlined_call_operand.hbm [shape: f32[8,128], index: 3, kind: output, shape index: {0}]   ;;  %s531_s4 = inlined_call_operand.hbm [shape: f32[8,128], index: 4, kind: output, shape index: {1}]  }
   0x1   :  { %11 = vsyncpa [#allocation6], 0 }
   0x2   :  { %12 = vsyncpa [#allocation4], 0 }
   0x3   :  { %13 = vsyncpa [#allocation10], 0  ;;  %s480_s15 = smov [#allocation5]  }
   0x4   :  { %s29_s16 = sshll.u32 %s480_s15, 4  ;;  %s30_s16 = int_to_ptr.vmem [resolvable:$true] %s29_s16 }
   0x5   :  { %s380_s17 = scalar_lea.vmem %s30_s16, 4096  ;;  %p385_p1 = scmp.lt.s32.totalorder %s30_s16, %s30_s16 }
   0x6   :  { %p381_p0 = scmp.ne.s32.totalorder %s30_s16, %s380_s17  ;;  %p386_p2 = scmp.lt.s32.totalorder %s380_s17, %s380_s17 }
   0x8   :  { %p387_p3 = por %p386_p2, %p385_p1 }
   0xa   :  { %p388_p4 = pnand %p387_p3, %p381_p0 }
   0xc   :  { %391 = shalt.err (!%p388_p4)
}
   0xd   :  { %s481_s18 = smov 128   ;;  %s482_s19 = smov 8  }
   0xe   :  { %35 = dma.hbm_to_vmem [thread:$0]  %s528_s1, 4096, %s30_s16, [#allocation6], %s481_s18, %s481_s18, %s482_s19  }
   0xf   :  { %s483_s22 = smov [#allocation2]   ;;  %s484_s24 = smov [#allocation7]  }
  0x10   :  { %s20_s23 = sshll.u32 %s483_s22, 4  ;;  %s41_s25 = sshll.u32 %s484_s24, 4  ;;  %s21_s23 = int_to_ptr.vmem [resolvable:$true] %s20_s23  ;;  %s42_s25 = int_to_ptr.vmem [resolvable:$true] %s41_s25 }
  0x11   :  { %s400_s26 = scalar_lea.vmem %s21_s23, 256  ;;  %p405_p6 = scmp.lt.s32.totalorder %s21_s23, %s21_s23 }
  0x12   :  { %p401_p5 = scmp.ne.s32.totalorder %s21_s23, %s400_s26  ;;  %p406_p7 = scmp.lt.s32.totalorder %s400_s26, %s400_s26 }
  0x14   :  { %p407_p8 = por %p406_p7, %p405_p6 }
  0x16   :  { %p408_p9 = pnand %p407_p8, %p401_p5 }
  0x18   :  { %411 = shalt.err (!%p408_p9)
}
  0x19   :  { %23 = dma.hbm_to_vmem [thread:$0]  %s527_s0, 256, %s21_s23, [#allocation3]  }
  0x1a   :  { %s420_s29 = scalar_lea.vmem %s42_s25, 4096  ;;  %p425_p11 = scmp.lt.s32.totalorder %s42_s25, %s42_s25 }
  0x1b   :  { %p421_p10 = scmp.ne.s32.totalorder %s42_s25, %s420_s29  ;;  %p426_p12 = scmp.lt.s32.totalorder %s420_s29, %s420_s29 }
  0x1d   :  { %p427_p13 = por %p426_p12, %p425_p11 }
  0x1f   :  { %p428_p0 = pnand %p427_p13, %p421_p10 }
  0x21   :  { %431 = shalt.err (!%p428_p0)
}
  0x22   :  { %47 = dma.hbm_to_vmem [thread:$0]  %s529_s2, 4096, %s42_s25, [#allocation6], %s481_s18, %s481_s18, %s482_s19  }
  0x23   :  { %472 = dma.done.wait [#allocation3], 256  }
  0x24   :  { %473 = vsyncadd [#allocation3], 4294967040 }
  0x25   :  { %474 = dma.done.wait [#allocation6], 8192  }
  0x26   :  { %475 = vsyncadd [#allocation6], 4294959104  ;;  %v90_v0 = vld [vmem:[#allocation5 + $0xf8] sm:$0xff]  ;;  %v89_v4 = vld [vmem:[#allocation5 + $0xf0] sm:$0xff]  ;;  %s485_s0 = smov [#allocation8]   ;;  %s486_s5 = smov [#allocation9]  }
  0x27   :  { %v193_v1 = vld [vmem:[#allocation7 + $0xf8] sm:$0xff]  ;;  %295 = vmatprep.subr.mxu0 %v90_v0  ;;  %v192_v5 = vld [vmem:[#allocation7 + $0xf0] sm:$0xff]  ;;  %v88_v8 = vld [vmem:[#allocation5 + $0xe8] sm:$0xff]  ;;  %s271_s2 = sshll.u32 %s485_s0, 4  ;;  %s281_s6 = sshll.u32 %s486_s5, 4  ;;  %s272_s2 = int_to_ptr.vmem [resolvable:$true] %s271_s2  ;;  %s282_s6 = int_to_ptr.vmem [resolvable:$true] %s281_s6 }
  0x28   :  { %v74_v2 = vld [vmem:[#allocation5 + $0x78] sm:$0xff]  ;;  %330 = vmatprep.subr.mxu1 %v193_v1  ;;  %v73_v6 = vld [vmem:[#allocation5 + $0x70] sm:$0xff]  ;;  %v191_v9 = vld [vmem:[#allocation7 + $0xe8] sm:$0xff]  ;;  %s432_s7 = scalar_lea.vmem %s272_s2, 128  ;;  %p437_p2 = scmp.lt.s32.totalorder %s272_s2, %s272_s2 }
  0x29   :  { %v177_v3 = vld [vmem:[#allocation7 + $0x78] sm:$0xff]  ;;  %296 = vmatpush3.msra.mxu0 %v74_v2  ;;  %v176_v7 = vld [vmem:[#allocation7 + $0x70] sm:$0xff]  ;;  %v72_v10 = vld [vmem:[#allocation5 + $0x68] sm:$0xff]  ;;  %p433_p1 = scmp.ne.s32.totalorder %s272_s2, %s432_s7  ;;  %p438_p3 = scmp.lt.s32.totalorder %s432_s7, %s432_s7 }
  0x2a   :  { %331 = vmatpush3.msra.mxu1 %v177_v3  ;;  %297 = vmatprep.subr.mxu0 %v89_v4  ;;  %v175_v11 = vld [vmem:[#allocation7 + $0x68] sm:$0xff]  ;;  %v87_v12 = vld [vmem:[#allocation5 + $0xe0] sm:$0xff]  ;;  %v86_v16 = vld [vmem:[#allocation5 + $0xd8] sm:$0xff] }
  0x2b   :  { %332 = vmatprep.subr.mxu1 %v192_v5  ;;  %298 = vmatpush3.msra.mxu0 %v73_v6  ;;  %v190_v13 = vld [vmem:[#allocation7 + $0xe0] sm:$0xff]  ;;  %v189_v17 = vld [vmem:[#allocation7 + $0xd8] sm:$0xff]  ;;  %v85_v20 = vld [vmem:[#allocation5 + $0xd0] sm:$0xff]  ;;  %p439_p4 = por %p438_p3, %p437_p2 }
  0x2c   :  { %333 = vmatpush3.msra.mxu1 %v176_v7  ;;  %299 = vmatprep.subr.mxu0 %v88_v8  ;;  %v71_v14 = vld [vmem:[#allocation5 + $0x60] sm:$0xff]  ;;  %v70_v18 = vld [vmem:[#allocation5 + $0x58] sm:$0xff]  ;;  %v188_v21 = vld [vmem:[#allocation7 + $0xd0] sm:$0xff] }
  0x2d   :  { %334 = vmatprep.subr.mxu1 %v191_v9  ;;  %v174_v15 = vld [vmem:[#allocation7 + $0x60] sm:$0xff]  ;;  %300 = vmatpush3.msra.mxu0 %v72_v10  ;;  %v173_v19 = vld [vmem:[#allocation7 + $0x58] sm:$0xff]  ;;  %v69_v22 = vld [vmem:[#allocation5 + $0x50] sm:$0xff]  ;;  %p440_p5 = pnand %p439_p4, %p433_p1 }
  0x2e   :  { %335 = vmatpush3.msra.mxu1 %v175_v11  ;;  %301 = vmatprep.subr.mxu0 %v87_v12  ;;  %v172_v23 = vld [vmem:[#allocation7 + $0x50] sm:$0xff]  ;;  %v84_v24 = vld [vmem:[#allocation5 + $0xc8] sm:$0xff]  ;;  %v83_v28 = vld [vmem:[#allocation5 + $0xc0] sm:$0xff] }
  0x2f   :  { %336 = vmatprep.subr.mxu1 %v190_v13  ;;  %302 = vmatpush3.msra.mxu0 %v71_v14  ;;  %v187_v25 = vld [vmem:[#allocation7 + $0xc8] sm:$0xff]  ;;  %v186_v29 = vld [vmem:[#allocation7 + $0xc0] sm:$0xff]  ;;  %v82_v32 = vld [vmem:[#allocation5 + $0xb8] sm:$0xff] }
  0x30   :  { %337 = vmatpush3.msra.mxu1 %v174_v15  ;;  %303 = vmatprep.subr.mxu0 %v86_v16  ;;  %v68_v26 = vld [vmem:[#allocation5 + $0x48] sm:$0xff]  ;;  %v67_v30 = vld [vmem:[#allocation5 + $0x40] sm:$0xff]  ;;  %v185_v33 = vld [vmem:[#allocation7 + $0xb8] sm:$0xff] }
  0x31   :  { %338 = vmatprep.subr.mxu1 %v189_v17  ;;  %304 = vmatpush3.msra.mxu0 %v70_v18  ;;  %v171_v27 = vld [vmem:[#allocation7 + $0x48] sm:$0xff]  ;;  %v170_v31 = vld [vmem:[#allocation7 + $0x40] sm:$0xff]  ;;  %v66_v34 = vld [vmem:[#allocation5 + $0x38] sm:$0xff] }
  0x32   :  { %339 = vmatpush3.msra.mxu1 %v173_v19  ;;  %305 = vmatprep.subr.mxu0 %v85_v20  ;;  %v169_v35 = vld [vmem:[#allocation7 + $0x38] sm:$0xff]  ;;  %v81_v36 = vld [vmem:[#allocation5 + $0xb0] sm:$0xff]  ;;  %v80_v40 = vld [vmem:[#allocation5 + $0xa8] sm:$0xff] }
  0x33   :  { %340 = vmatprep.subr.mxu1 %v188_v21  ;;  %306 = vmatpush3.msra.mxu0 %v69_v22  ;;  %v184_v37 = vld [vmem:[#allocation7 + $0xb0] sm:$0xff]  ;;  %v183_v41 = vld [vmem:[#allocation7 + $0xa8] sm:$0xff]  ;;  %v79_v44 = vld [vmem:[#allocation5 + $0xa0] sm:$0xff] }
  0x34   :  { %341 = vmatpush3.msra.mxu1 %v172_v23  ;;  %307 = vmatprep.subr.mxu0 %v84_v24  ;;  %v65_v38 = vld [vmem:[#allocation5 + $0x30] sm:$0xff]  ;;  %v64_v42 = vld [vmem:[#allocation5 + $0x28] sm:$0xff]  ;;  %v182_v45 = vld [vmem:[#allocation7 + $0xa0] sm:$0xff] }
  0x35   :  { %342 = vmatprep.subr.mxu1 %v187_v25  ;;  %308 = vmatpush3.msra.mxu0 %v68_v26  ;;  %v168_v39 = vld [vmem:[#allocation7 + $0x30] sm:$0xff]  ;;  %v167_v43 = vld [vmem:[#allocation7 + $0x28] sm:$0xff]  ;;  %v63_v46 = vld [vmem:[#allocation5 + $0x20] sm:$0xff] }
  0x36   :  { %343 = vmatpush3.msra.mxu1 %v171_v27  ;;  %309 = vmatprep.subr.mxu0 %v83_v28  ;;  %v166_v47 = vld [vmem:[#allocation7 + $0x20] sm:$0xff]  ;;  %v78_v48 = vld [vmem:[#allocation5 + $0x98] sm:$0xff]  ;;  %v77_v52 = vld [vmem:[#allocation5 + $0x90] sm:$0xff] }
  0x37   :  { %344 = vmatprep.subr.mxu1 %v186_v29  ;;  %310 = vmatpush3.msra.mxu0 %v67_v30  ;;  %v181_v49 = vld [vmem:[#allocation7 + $0x98] sm:$0xff]  ;;  %v180_v53 = vld [vmem:[#allocation7 + $0x90] sm:$0xff]  ;;  %v76_v56 = vld [vmem:[#allocation5 + $0x88] sm:$0xff] }
  0x38   :  { %345 = vmatpush3.msra.mxu1 %v170_v31  ;;  %311 = vmatprep.subr.mxu0 %v82_v32  ;;  %v62_v50 = vld [vmem:[#allocation5 + $0x18] sm:$0xff]  ;;  %v61_v54 = vld [vmem:[#allocation5 + $0x10] sm:$0xff]  ;;  %v179_v57 = vld [vmem:[#allocation7 + $0x88] sm:$0xff] }
  0x39   :  { %346 = vmatprep.subr.mxu1 %v185_v33  ;;  %312 = vmatpush3.msra.mxu0 %v66_v34  ;;  %v165_v51 = vld [vmem:[#allocation7 + $0x18] sm:$0xff]  ;;  %v164_v55 = vld [vmem:[#allocation7 + $0x10] sm:$0xff]  ;;  %v60_v58 = vld [vmem:[#allocation5 + $0x8] sm:$0xff] }
  0x3a   :  { %347 = vmatpush3.msra.mxu1 %v169_v35  ;;  %313 = vmatprep.subr.mxu0 %v81_v36  ;;  %v163_v59 = vld [vmem:[#allocation7 + $0x8] sm:$0xff]  ;;  %v75_v60 = vld [vmem:[#allocation5 + $0x80] sm:$0xff]  ;;  %v58_v63 = vld [vmem:[#allocation2 + $0x8] sm:$0xff] }
  0x3b   :  { %348 = vmatprep.subr.mxu1 %v184_v37  ;;  %314 = vmatpush3.msra.mxu0 %v65_v38  ;;  %v178_v61 = vld [vmem:[#allocation7 + $0x80] sm:$0xff]  ;;  %v57_v1 = vld [vmem:[#allocation2] sm:$0xff] }
  0x3c   :  { %349 = vmatpush3.msra.mxu1 %v168_v39  ;;  %315 = vmatprep.subr.mxu0 %v80_v40  ;;  %v59_v62 = vld [vmem:[#allocation5] sm:$0xff] }
  0x3d   :  { %350 = vmatprep.subr.mxu1 %v183_v41  ;;  %316 = vmatpush3.msra.mxu0 %v64_v42  ;;  %v162_v0 = vld [vmem:[#allocation7] sm:$0xff] }
  0x3e   :  { %351 = vmatpush3.msra.mxu1 %v167_v43  ;;  %317 = vmatprep.subr.mxu0 %v79_v44 }
  0x3f   :  { %352 = vmatprep.subr.mxu1 %v182_v45  ;;  %318 = vmatpush3.msra.mxu0 %v63_v46 }
  0x40   :  { %353 = vmatpush3.msra.mxu1 %v166_v47  ;;  %319 = vmatprep.subr.mxu0 %v78_v48 }
  0x41   :  { %354 = vmatprep.subr.mxu1 %v181_v49  ;;  %320 = vmatpush3.msra.mxu0 %v62_v50 }
  0x42   :  { %355 = vmatpush3.msra.mxu1 %v165_v51  ;;  %321 = vmatprep.subr.mxu0 %v77_v52 }
  0x43   :  { %356 = vmatprep.subr.mxu1 %v180_v53  ;;  %322 = vmatpush3.msra.mxu0 %v61_v54 }
  0x44   :  { %357 = vmatpush3.msra.mxu1 %v164_v55  ;;  %323 = vmatprep.subr.mxu0 %v76_v56 }
  0x45   :  { %358 = vmatprep.subr.mxu1 %v179_v57  ;;  %324 = vmatpush3.msra.mxu0 %v60_v58 }
  0x46   :  { %359 = vmatpush3.msra.mxu1 %v163_v59  ;;  %325 = vmatprep.subr.mxu0 %v75_v60 }
  0x47   :  { %360 = vmatprep.subr.mxu1 %v178_v61  ;;  %326 = vmatpush3.msra.mxu0 %v59_v62 }
  0x48   :  { %155 = vmatprep.mubr.f32.mxu0 %v58_v63  ;;  %361 = vmatpush3.msra.mxu1 %v162_v0 }
  0x49   :  { %258 = vmatprep.mubr.f32.mxu1 %v58_v63  ;;  %156 = vmatmul.mubr.f32.vlgmr.msra.gmra.mxu0 %v57_v1 }
  0x4a   :  { %259 = vmatmul.mubr.f32.vlgmr.msra.gmra.mxu1 %v57_v1 }
 0x109   :  { %v327_v2 = vpop.f32.mrf.mxu0 }
 0x10a   :  { %v362_v3 = vpop.f32.mrf.mxu1 }
 0x10b   :  { %v328_v4 = vpop.f32.mrf.mxu0 }
 0x10c   :  { %v363_v5 = vpop.f32.mrf.mxu1  ;;  %v329_v6 = vadd.f32 %v328_v4, %v327_v2 }
 0x10d   :  { %v364_v7 = vadd.f32 %v363_v5, %v362_v3 }
 0x10e   :  { %161 = vst [vmem:[#allocation8] sm:$0xff] %v329_v6 }
 0x10f   :  { %264 = vst [vmem:[#allocation9] sm:$0xff] %v364_v7 }
 0x110   :  { %443 = shalt.err (!%p440_p5)
}
 0x111   :  { %274 = dma.vmem_to_hbm [thread:$0]  %s272_s2, 128, %s530_s3, [#allocation4]  }
 0x112   :  { %s452_s10 = scalar_lea.vmem %s282_s6, 128  ;;  %p457_p7 = scmp.lt.s32.totalorder %s282_s6, %s282_s6 }
 0x113   :  { %p453_p6 = scmp.ne.s32.totalorder %s282_s6, %s452_s10  ;;  %p458_p8 = scmp.lt.s32.totalorder %s452_s10, %s452_s10 }
 0x115   :  { %p459_p9 = por %p458_p8, %p457_p7 }
 0x117   :  { %p460_p10 = pnand %p459_p9, %p453_p6 }
 0x119   :  { %463 = shalt.err (!%p460_p10)
}
 0x11a   :  { %284 = dma.vmem_to_hbm [thread:$0]  %s282_s6, 128, %s531_s4, [#allocation10]  }
 0x11b   :  { %476 = dma.done.wait [#allocation4], 128  }
 0x11c   :  { %477 = vsyncadd [#allocation4], 4294967168 }
 0x11d   :  { %478 = dma.done.wait [#allocation10], 128  }
 0x11e   :  { %479 = vsyncadd [#allocation10], 4294967168 }
 0x11f   :  { %291 = vsyncpa [#allocation3], 1 }
 0x120   :  { %292 = vsyncpa [#allocation6], 1 }
 0x121   :  { %293 = vsyncpa [#allocation4], 1 }
 0x122   :  { %294 = vsyncpa [#allocation10], 1 }

</bundles_post_ra>
